<compile_context>
chip_gen: v6e
topology: v6e:2x2x1
jax: 0.10.0
libtpu: 0.0.40
codegen_flags: <defaults>
</compile_context>

<pallas_src>
import functools

import jax
import jax.numpy as jnp
from jax.experimental import pallas as pl
from jax.experimental.pallas import tpu as pltpu


def _round_up(n, m):
    return ((n + m - 1) // m) * m


def _pad_gate_blocks(a, H, Hp):
    """Pad the last axis [..., 4*H] gate-block-wise to [..., 4*Hp] with zeros."""
    if Hp == H:
        return a
    lead = a.shape[:-1]
    a = a.reshape(lead + (4, H))
    a = jnp.pad(a, [(0, 0)] * len(lead) + [(0, 0), (0, Hp - H)])
    return a.reshape(lead + (4 * Hp,))


# ----------------------------------------------------------------------------
# Kernel: one grid step = one LSTM time step for one batch tile.
#   p_ref  : [1, TB, 4*Hp]  precomputed (x|s|t)-projection + bias (f32)
#   u_ref  : [Hp, 4*Hp]     recurrent weight U^T (gate-padded), VMEM-resident
#   h0/c0  : [TB, Hp]       initial state (f32, zero-padded)
#   h_out  : [T, .., Hp] per-step hidden output (activation dtype)
#   c_out  : [TB, Hp]       final cell state (float32)
#   h_sc/c_sc : float32 VMEM scratch carrying the recurrent state
# ----------------------------------------------------------------------------
def _lstm_seq_kernel(p_ref, u_ref, h0_ref, c0_ref, h_out_ref, c_out_ref,
                     h_sc, c_sc, *, Hp):
    t_idx = pl.program_id(1)

    @pl.when(t_idx == 0)
    def _():
        h_sc[...] = h0_ref[...].astype(jnp.float32)
        c_sc[...] = c0_ref[...].astype(jnp.float32)

    # Gate pre-activations: precomputed input term + h @ U^T    -> [TB, 4*Hp]
    pre = p_ref[0].astype(jnp.float32) + jnp.dot(
        h_sc[...].astype(u_ref.dtype), u_ref[...],
        preferred_element_type=jnp.float32)

    # Gate packing i, f, o, g as in the reference module. Each slice is a
    # lane-dense multiple of 128 thanks to the Hp padding.
    input_g = jax.nn.sigmoid(pre[:, 0 * Hp:1 * Hp])
    forget_g = jax.nn.sigmoid(pre[:, 1 * Hp:2 * Hp])
    output_g = jax.nn.sigmoid(pre[:, 2 * Hp:3 * Hp])
    cell_g = jnp.tanh(pre[:, 3 * Hp:4 * Hp])

    c_new = forget_g * c_sc[...] + input_g * cell_g
    h_new = output_g * jnp.tanh(c_new)

    c_sc[...] = c_new
    h_sc[...] = h_new

    h_out_ref[0] = h_new.astype(h_out_ref.dtype)
    c_out_ref[...] = c_new  # float32 cell state, no per-step rounding


# ----------------------------------------------------------------------------
# Wrappers
# ----------------------------------------------------------------------------
def pack_lstm_params(W, U, s_W, t_W, bias, *, weight_dtype=None):
    """Pack / pad parameters once (constant across all calls / all steps).

    W, s_W, t_W : [4H, input]   (PyTorch nn.Linear layout)
    U           : [4H, H]
    bias        : [4H]          (bias of self.U)
    weight_dtype: optional storage dtype for the resident recurrent weight
                  (e.g. jnp.bfloat16 to halve VMEM/HBM bytes).
    """
    H = U.shape[1]
    assert U.shape[0] == 4 * H
    Hp = _round_up(H, 128)

    # Fused non-recurrent projection weight: [3*input, 4H]
    Win = jnp.concatenate([W.T, s_W.T, t_W.T], axis=0)

    # Recurrent weight U^T, gate-block padded then row padded: [Hp, 4*Hp]
    Ut = _pad_gate_blocks(U.T, H, Hp)
    Ut = jnp.pad(Ut, ((0, Hp - H), (0, 0)))
    if weight_dtype is not None:
        Ut = Ut.astype(weight_dtype)

    return dict(Win=Win, Ut=Ut, bias=bias.astype(jnp.float32), H=H, Hp=Hp)


def lstm_sequence(x_seq, spatial_seq, temporal_seq, h0, c0, params):
    """Run T LSTMCell steps inside ONE pallas_call.

    x_seq, spatial_seq, temporal_seq : [T, B, input_size]
    h0, c0                           : [B, H]
    Returns (h_seq [T, B, H], c_final [B, H]).
    """
    H, Hp = params["H"], params["Hp"]
    T, B, _ = x_seq.shape
    dtype = x_seq.dtype
    itemsize = jnp.dtype(dtype).itemsize

    # Precompute all non-recurrent gate pre-activations (+ bias) as one big
    # sequence-level matmul, outside the recurrence.
    z = jnp.concatenate([x_seq, spatial_seq, temporal_seq], axis=-1)  # [T,B,3in]
    P = jnp.einsum("tbk,kg->tbg", z, params["Win"],
                   preferred_element_type=jnp.float32) + params["bias"]
    P = _pad_gate_blocks(P, H, Hp)                                    # [T,B,4Hp]

    TB = min(_round_up(B, 8), 128)        # batch tile (sublane aligned)
    Bp = _round_up(B, TB)
    nb = Bp // TB

    P = jnp.pad(P, ((0, 0), (0, Bp - B), (0, 0)))
    h0p = jnp.pad(h0, ((0, Bp - B), (0, Hp - H))).astype(jnp.float32)
    c0p = jnp.pad(c0, ((0, Bp - B), (0, Hp - H))).astype(jnp.float32)
    Ut = params["Ut"]

    # VMEM budget with headroom (v5e's scoped default is only 16 MiB).
    est = (Ut.size * jnp.dtype(Ut.dtype).itemsize     # resident weight
           + 2 * TB * 4 * Hp * 4                      # double-buffered P tile
           + 2 * TB * Hp * itemsize                   # double-buffered h_out
           + 6 * TB * Hp * 4)                         # h0/c0/c_out/scratch
    vmem_limit = int(min(max(2 * est, 32 * 1024 * 1024), 64 * 1024 * 1024))

    kernel = functools.partial(_lstm_seq_kernel, Hp=Hp)
    h_seq_p, c_fin_p = pl.pallas_call(
        kernel,
        out_shape=(
            jax.ShapeDtypeStruct((T, Bp, Hp), dtype),     # per-step h
            jax.ShapeDtypeStruct((Bp, Hp), jnp.float32),  # final c (f32)
        ),
        grid=(nb, T),
        in_specs=[
            pl.BlockSpec((1, TB, 4 * Hp), lambda b, t: (t, b, 0)),  # P[t]
            pl.BlockSpec((Hp, 4 * Hp), lambda b, t: (0, 0)),        # U resident
            pl.BlockSpec((TB, Hp), lambda b, t: (b, 0)),            # h0
            pl.BlockSpec((TB, Hp), lambda b, t: (b, 0)),            # c0
        ],
        out_specs=(
            pl.BlockSpec((1, TB, Hp), lambda b, t: (t, b, 0)),
            pl.BlockSpec((TB, Hp), lambda b, t: (b, 0)),
        ),
        scratch_shapes=[pltpu.VMEM((TB, Hp), jnp.float32),
                        pltpu.VMEM((TB, Hp), jnp.float32)],
        compiler_params=pltpu.CompilerParams(
            dimension_semantics=("parallel", "arbitrary"),
            vmem_limit_bytes=vmem_limit),
    )(P, Ut, h0p, c0p)

    return h_seq_p[:, :B, :H], c_fin_p[:B, :H].astype(dtype)


def lstm_cell(x, hidden, spatial, temporal, W, U, s_W, t_W, bias):
    """One LSTMCell step (the PyTorch module's forward). Returns (h, c)."""
    B = x.shape[0]
    H = U.shape[1]
    if hidden is None:
        hidden = (jnp.zeros((B, H), x.dtype), jnp.zeros((B, H), x.dtype))
    h, c = hidden
    params = pack_lstm_params(W, U, s_W, t_W, bias)
    h_seq, c_fin = lstm_sequence(x[None], spatial[None], temporal[None],
                                 h, c, params)
    return h_seq[0], c_fin


# ----------------------------------------------------------------------------
# Pure-JAX references
# ----------------------------------------------------------------------------
def reference_lstm_cell(x, hidden, spatial, temporal, W, U, s_W, t_W, bias):
    h, c = hidden
    H = h.shape[1]
    pre = x @ W.T + (h @ U.T + bias) + spatial @ s_W.T + temporal @ t_W.T
    i = jax.nn.sigmoid(pre[:, 0:H])
    f = jax.nn.sigmoid(pre[:, H:2 * H])
    o = jax.nn.sigmoid(pre[:, 2 * H:3 * H])
    g = jnp.tanh(pre[:, 3 * H:4 * H])
    c_new = f * c + i * g
    h_new = o * jnp.tanh(c_new)
    return h_new, c_new


def reference_lstm_sequence(x_seq, s_seq, t_seq, h0, c0, W, U, s_W, t_W, bias):
    h, c = h0, c0
    hs = []
    for step in range(x_seq.shape[0]):
        h, c = reference_lstm_cell(x_seq[step], (h, c), s_seq[step],
                                   t_seq[step], W, U, s_W, t_W, bias)
        hs.append(h)
    return jnp.stack(hs), c


if __name__ == "__main__":
    input_size = 16
    hidden_size = 32
    batch = 2
    seq_len = 8

    key = jax.random.PRNGKey(0)
    ks = jax.random.split(key, 13)

    # Parameters (PyTorch nn.Linear layout [out_features, in_features]).
    # Gate packing is i, f, o, g as in the reference module.
    def linear_weight(k, out_f, in_f):
        bound = 1.0 / jnp.sqrt(in_f)
        return jax.random.uniform(k, (out_f, in_f), jnp.float32, -bound, bound)

    W = linear_weight(ks[0], 4 * hidden_size, input_size)     # self.W  (no bias)
    U = linear_weight(ks[1], 4 * hidden_size, hidden_size)    # self.U
    U_bias = jax.random.uniform(
        ks[2], (4 * hidden_size,), jnp.float32,
        -1.0 / jnp.sqrt(hidden_size), 1.0 / jnp.sqrt(hidden_size))
    s_W = linear_weight(ks[3], 4 * hidden_size, input_size)   # self.s_W (no bias)
    t_W = linear_weight(ks[4], 4 * hidden_size, input_size)   # self.t_W (no bias)

    # Inputs
    x = jax.random.normal(ks[5], (batch, input_size), jnp.float32)
    spatial = jax.random.normal(ks[6], (batch, input_size), jnp.float32)
    temporal = jax.random.normal(ks[7], (batch, input_size), jnp.float32)
    h0 = jax.random.normal(ks[8], (batch, hidden_size), jnp.float32)
    c0 = jax.random.normal(ks[9], (batch, hidden_size), jnp.float32)

    # ---- single step (the module's forward) -------------------------------
    h1, c1 = lstm_cell(x, (h0, c0), spatial, temporal, W, U, s_W, t_W, U_bias)
    jax.block_until_ready((h1, c1))
    h1_ref, c1_ref = reference_lstm_cell(x, (h0, c0), spatial, temporal,
                                         W, U, s_W, t_W, U_bias)
    assert h1.shape == (batch, hidden_size)
    assert c1.shape == (batch, hidden_size)
    assert jnp.allclose(h1, h1_ref, atol=1e-4, rtol=1e-4)
    assert jnp.allclose(c1, c1_ref, atol=1e-4, rtol=1e-4)

    # ---- full sequence inside one pallas_call ------------------------------
    x_seq = jax.random.normal(ks[10], (seq_len, batch, input_size), jnp.float32)
    s_seq = jax.random.normal(ks[11], (seq_len, batch, input_size), jnp.float32)
    t_seq = jax.random.normal(ks[12], (seq_len, batch, input_size), jnp.float32)

    params = pack_lstm_params(W, U, s_W, t_W, U_bias)
    h_seq, c_fin = lstm_sequence(x_seq, s_seq, t_seq, h0, c0, params)
    jax.block_until_ready((h_seq, c_fin))

    h_seq_ref, c_fin_ref = reference_lstm_sequence(
        x_seq, s_seq, t_seq, h0, c0, W, U, s_W, t_W, U_bias)
    assert h_seq.shape == (seq_len, batch, hidden_size)
    assert c_fin.shape == (batch, hidden_size)
    assert jnp.allclose(h_seq, h_seq_ref, atol=1e-4, rtol=1e-4)
    assert jnp.allclose(c_fin, c_fin_ref, atol=1e-4, rtol=1e-4)

    print("KERNEL_OK")
</pallas_src>

<mosaic_0001>
module attributes {stable_mosaic.version = 11 : i64} {
  func.func @_lstm_seq_kernel(%arg0: i32, %arg1: i32, %arg2: memref<1x8x512xf32, #tpu.memory_space<vmem>>, %arg3: memref<128x512xf32, #tpu.memory_space<vmem>>, %arg4: memref<8x128xf32, #tpu.memory_space<vmem>>, %arg5: memref<8x128xf32, #tpu.memory_space<vmem>>, %arg6: memref<1x8x128xf32, #tpu.memory_space<vmem>>, %arg7: memref<8x128xf32, #tpu.memory_space<vmem>>, %arg8: memref<8x128xf32, #tpu.memory_space<vmem>>, %arg9: memref<8x128xf32, #tpu.memory_space<vmem>>) attributes {dimension_semantics = [#tpu.dimension_semantics<parallel>, #tpu.dimension_semantics<arbitrary>], iteration_bounds = array<i64: 1, 1>, scalar_prefetch = 0 : i64, scratch_operands = 2 : i64, tpu.core_type = #tpu.core_type<tc>, window_params = [{transform_indices = @transform_0, window_bounds = array<i64: 1, 8, 512>}, {pipeline_mode = #tpu.pipeline_mode<synchronous>, transform_indices = @transform_1, window_bounds = array<i64: 128, 512>}, {transform_indices = @transform_2, window_bounds = array<i64: 8, 128>}, {transform_indices = @transform_3, window_bounds = array<i64: 8, 128>}, {transform_indices = @transform_4, window_bounds = array<i64: 1, 8, 128>}, {transform_indices = @transform_5, window_bounds = array<i64: 8, 128>}]} {
    %c0_i32 = arith.constant 0 : i32
    %0 = arith.cmpi eq, %arg1, %c0_i32 : i32
    %1 = arith.extui %0 : i1 to i32
    %c0_i32_0 = arith.constant 0 : i32
    %2 = arith.cmpi ne, %1, %c0_i32_0 : i32
    scf.if %2 {
      %c0_21 = arith.constant 0 : index
      %c0_22 = arith.constant 0 : index
      %41 = vector.load %arg4[%c0_21, %c0_22] : memref<8x128xf32, #tpu.memory_space<vmem>>, vector<8x128xf32>
      %c0_23 = arith.constant 0 : index
      %c0_24 = arith.constant 0 : index
      %42 = vector.load %arg8[%c0_23, %c0_24] : memref<8x128xf32, #tpu.memory_space<vmem>>, vector<8x128xf32>
      tpu.vector_store %arg8[%c0_23, %c0_24], %41 {strides = array<i32>} : memref<8x128xf32, #tpu.memory_space<vmem>>, vector<8x128xf32>,
      %c0_25 = arith.constant 0 : index
      %c0_26 = arith.constant 0 : index
      %43 = vector.load %arg5[%c0_25, %c0_26] : memref<8x128xf32, #tpu.memory_space<vmem>>, vector<8x128xf32>
      %c0_27 = arith.constant 0 : index
      %c0_28 = arith.constant 0 : index
      %44 = vector.load %arg9[%c0_27, %c0_28] : memref<8x128xf32, #tpu.memory_space<vmem>>, vector<8x128xf32>
      tpu.vector_store %arg9[%c0_27, %c0_28], %43 {strides = array<i32>} : memref<8x128xf32, #tpu.memory_space<vmem>>, vector<8x128xf32>,
    } else {
    }
    %c0 = arith.constant 0 : index
    %c0_1 = arith.constant 0 : index
    %c0_2 = arith.constant 0 : index
    %3 = vector.load %arg2[%c0, %c0_1, %c0_2] : memref<1x8x512xf32, #tpu.memory_space<vmem>>, vector<1x8x512xf32>
    %4 = vector.shape_cast %3 : vector<1x8x512xf32> to vector<8x512xf32>
    %c0_3 = arith.constant 0 : index
    %c0_4 = arith.constant 0 : index
    %5 = vector.load %arg8[%c0_3, %c0_4] : memref<8x128xf32, #tpu.memory_space<vmem>>, vector<8x128xf32>
    %c0_5 = arith.constant 0 : index
    %c0_6 = arith.constant 0 : index
    %6 = vector.load %arg3[%c0_5, %c0_6] : memref<128x512xf32, #tpu.memory_space<vmem>>, vector<128x512xf32>
    %cst = arith.constant dense<0.000000e+00> : vector<8x512xf32>
    %7 = tpu.matmul %5, %6, %cst {dimension_numbers = #tpu.dot_dimension_numbers<[1], [0], [0], [1], [0, 0, 1, 1], [], []>} : vector<8x128xf32>, vector<128x512xf32>, vector<8x512xf32> -> vector<8x512xf32>
    %8 = arith.addf %4, %7 : vector<8x512xf32>
    %9 = vector.extract_strided_slice %8 {offsets = [0, 0], sizes = [8, 128], strides = [1, 1]} : vector<8x512xf32> to vector<8x128xf32>
    %10 = arith.negf %9 : vector<8x128xf32>
    %11 = math.exp %10 : vector<8x128xf32>
    %cst_7 = arith.constant 1.000000e+00 : f32
    %12 = vector.broadcast %cst_7 : f32 to vector<8x128xf32>
    %13 = arith.addf %12, %11 : vector<8x128xf32>
    %14 = arith.divf %12, %13 : vector<8x128xf32>
    %15 = vector.extract_strided_slice %8 {offsets = [0, 128], sizes = [8, 128], strides = [1, 1]} : vector<8x512xf32> to vector<8x128xf32>
    %16 = arith.negf %15 : vector<8x128xf32>
    %17 = math.exp %16 : vector<8x128xf32>
    %cst_8 = arith.constant 1.000000e+00 : f32
    %18 = vector.broadcast %cst_8 : f32 to vector<8x128xf32>
    %19 = arith.addf %18, %17 : vector<8x128xf32>
    %20 = arith.divf %18, %19 : vector<8x128xf32>
    %21 = vector.extract_strided_slice %8 {offsets = [0, 256], sizes = [8, 128], strides = [1, 1]} : vector<8x512xf32> to vector<8x128xf32>
    %22 = arith.negf %21 : vector<8x128xf32>
    %23 = math.exp %22 : vector<8x128xf32>
    %cst_9 = arith.constant 1.000000e+00 : f32
    %24 = vector.broadcast %cst_9 : f32 to vector<8x128xf32>
    %25 = arith.addf %24, %23 : vector<8x128xf32>
    %26 = arith.divf %24, %25 : vector<8x128xf32>
    %27 = vector.extract_strided_slice %8 {offsets = [0, 384], sizes = [8, 128], strides = [1, 1]} : vector<8x512xf32> to vector<8x128xf32>
    %28 = math.tanh %27 : vector<8x128xf32>
    %c0_10 = arith.constant 0 : index
    %c0_11 = arith.constant 0 : index
    %29 = vector.load %arg9[%c0_10, %c0_11] : memref<8x128xf32, #tpu.memory_space<vmem>>, vector<8x128xf32>
    %30 = arith.mulf %20, %29 : vector<8x128xf32>
    %31 = arith.mulf %14, %28 : vector<8x128xf32>
    %32 = arith.addf %30, %31 : vector<8x128xf32>
    %33 = math.tanh %32 : vector<8x128xf32>
    %34 = arith.mulf %26, %33 : vector<8x128xf32>
    %c0_12 = arith.constant 0 : index
    %c0_13 = arith.constant 0 : index
    %35 = vector.load %arg9[%c0_12, %c0_13] : memref<8x128xf32, #tpu.memory_space<vmem>>, vector<8x128xf32>
    tpu.vector_store %arg9[%c0_12, %c0_13], %32 {strides = array<i32>} : memref<8x128xf32, #tpu.memory_space<vmem>>, vector<8x128xf32>,
    %c0_14 = arith.constant 0 : index
    %c0_15 = arith.constant 0 : index
    %36 = vector.load %arg8[%c0_14, %c0_15] : memref<8x128xf32, #tpu.memory_space<vmem>>, vector<8x128xf32>
    tpu.vector_store %arg8[%c0_14, %c0_15], %34 {strides = array<i32>} : memref<8x128xf32, #tpu.memory_space<vmem>>, vector<8x128xf32>,
    %c0_16 = arith.constant 0 : index
    %c0_17 = arith.constant 0 : index
    %c0_18 = arith.constant 0 : index
    %37 = vector.load %arg6[%c0_16, %c0_17, %c0_18] : memref<1x8x128xf32, #tpu.memory_space<vmem>>, vector<1x8x128xf32>
    %38 = vector.shape_cast %37 : vector<1x8x128xf32> to vector<8x128xf32>
    %39 = vector.shape_cast %34 : vector<8x128xf32> to vector<1x8x128xf32>
    tpu.vector_store %arg6[%c0_16, %c0_17, %c0_18], %39 {strides = array<i32>} : memref<1x8x128xf32, #tpu.memory_space<vmem>>, vector<1x8x128xf32>,
    %c0_19 = arith.constant 0 : index
    %c0_20 = arith.constant 0 : index
    %40 = vector.load %arg7[%c0_19, %c0_20] : memref<8x128xf32, #tpu.memory_space<vmem>>, vector<8x128xf32>
    tpu.vector_store %arg7[%c0_19, %c0_20], %32 {strides = array<i32>} : memref<8x128xf32, #tpu.memory_space<vmem>>, vector<8x128xf32>,
    return
  }
  func.func @transform_0(%arg0: i32, %arg1: i32) -> (i32, i32, i32) {
    %c0_i32 = arith.constant 0 : i32
    %c0_i32_0 = arith.constant 0 : i32
    return %arg1, %arg0, %c0_i32 : i32, i32, i32
  }
  func.func @transform_1(%arg0: i32, %arg1: i32) -> (i32, i32) {
    %c0_i32 = arith.constant 0 : i32
    %c0_i32_0 = arith.constant 0 : i32
    %c0_i32_1 = arith.constant 0 : i32
    return %c0_i32, %c0_i32_0 : i32, i32
  }
  func.func @transform_2(%arg0: i32, %arg1: i32) -> (i32, i32) {
    %c0_i32 = arith.constant 0 : i32
    %c0_i32_0 = arith.constant 0 : i32
    return %arg0, %c0_i32 : i32, i32
  }
  func.func @transform_3(%arg0: i32, %arg1: i32) -> (i32, i32) {
    %c0_i32 = arith.constant 0 : i32
    %c0_i32_0 = arith.constant 0 : i32
    return %arg0, %c0_i32 : i32, i32
  }
  func.func @transform_4(%arg0: i32, %arg1: i32) -> (i32, i32, i32) {
    %c0_i32 = arith.constant 0 : i32
    %c0_i32_0 = arith.constant 0 : i32
    return %arg1, %arg0, %c0_i32 : i32, i32, i32
  }
  func.func @transform_5(%arg0: i32, %arg1: i32) -> (i32, i32) {
    %c0_i32 = arith.constant 0 : i32
    %c0_i32_0 = arith.constant 0 : i32
    return %arg0, %c0_i32 : i32, i32
  }
}

</mosaic_0001>

<bundles_post_ra>
// kernel: tpu_custom_call.1
= control target key start
LH: loop header
LB: loop body
LE: loop exit
PB: predicated region body
PF: predicated region fallthrough
CT: control target
= control target key end

     0   :  { %11 = vsyncpa [#allocation5], 0  ;;  %s568_s0 = inlined_call_operand.hbm [shape: f32[1,8,512], index: 0, kind: input, shape index: {}]   ;;  %s569_s1 = inlined_call_operand.hbm [shape: f32[128,512], index: 1, kind: input, shape index: {}]   ;;  %s570_s2 = inlined_call_operand.hbm [shape: f32[8,128], index: 2, kind: input, shape index: {}]   ;;  %s571_s3 = inlined_call_operand.hbm [shape: f32[8,128], index: 3, kind: input, shape index: {}]   ;;  %s572_s4 = inlined_call_operand.hbm [shape: f32[1,8,128], index: 4, kind: output, shape index: {0}]   ;;  %s573_s5 = inlined_call_operand.hbm [shape: f32[8,128], index: 5, kind: output, shape index: {1}]  }
   0x1   :  { %12 = vsyncpa [#allocation8], 0 }
   0x2   :  { %13 = vsyncpa [#allocation11], 0 }
   0x3   :  { %14 = vsyncpa [#allocation6], 0 }
   0x4   :  { %15 = vsyncpa [#allocation14], 0  ;;  %s511_s18 = smov [#allocation7]  }
   0x5   :  { %s31_s19 = sshll.u32 %s511_s18, 4  ;;  %s32_s19 = int_to_ptr.vmem [resolvable:$true] %s31_s19 }
   0x6   :  { %s389_s20 = scalar_lea.vmem %s32_s19, 8192  ;;  %p394_p1 = scmp.lt.s32.totalorder %s32_s19, %s32_s19 }
   0x7   :  { %p390_p0 = scmp.ne.s32.totalorder %s32_s19, %s389_s20  ;;  %p395_p2 = scmp.lt.s32.totalorder %s389_s20, %s389_s20 }
   0x9   :  { %p396_p3 = por %p395_p2, %p394_p1 }
   0xb   :  { %p397_p4 = pnand %p396_p3, %p390_p0 }
   0xd   :  { %400 = shalt.err (!%p397_p4)
}
   0xe   :  { %s512_s21 = smov 512   ;;  %s513_s22 = smov 32  }
   0xf   :  { %37 = dma.hbm_to_vmem [thread:$0]  %s569_s1, 8192, %s32_s19, [#allocation8], %s512_s21, %s512_s21, %s513_s22  }
  0x10   :  { %s514_s25 = smov [#allocation4]   ;;  %s515_s27 = smov [#allocation9]  }
  0x11   :  { %s22_s26 = sshll.u32 %s514_s25, 4  ;;  %s44_s28 = sshll.u32 %s515_s27, 4  ;;  %s23_s26 = int_to_ptr.vmem [resolvable:$true] %s22_s26  ;;  %s45_s28 = int_to_ptr.vmem [resolvable:$true] %s44_s28 }
  0x12   :  { %s409_s29 = scalar_lea.vmem %s23_s26, 512  ;;  %p414_p6 = scmp.lt.s32.totalorder %s23_s26, %s23_s26 }
  0x13   :  { %p410_p5 = scmp.ne.s32.totalorder %s23_s26, %s409_s29  ;;  %p415_p7 = scmp.lt.s32.totalorder %s409_s29, %s409_s29 }
  0x15   :  { %p416_p8 = por %p415_p7, %p414_p6 }
  0x17   :  { %p417_p9 = pnand %p416_p8, %p410_p5 }
  0x19   :  { %420 = shalt.err (!%p417_p9)
}
  0x1a   :  { %25 = dma.hbm_to_vmem [thread:$0]  %s568_s0, 512, %s23_s26, [#allocation5]  }
  0x1b   :  { %s429_s7 = scalar_lea.vmem %s45_s28, 128  ;;  %p434_p11 = scmp.lt.s32.totalorder %s45_s28, %s45_s28 }
  0x1c   :  { %p430_p10 = scmp.ne.s32.totalorder %s45_s28, %s429_s7  ;;  %p435_p12 = scmp.lt.s32.totalorder %s429_s7, %s429_s7 }
  0x1e   :  { %p436_p13 = por %p435_p12, %p434_p11 }
  0x20   :  { %p437_p0 = pnand %p436_p13, %p430_p10 }
  0x22   :  { %440 = shalt.err (!%p437_p0)
}
  0x23   :  { %47 = dma.hbm_to_vmem [thread:$0]  %s570_s2, 128, %s45_s28, [#allocation8]  }
  0x24   :  { %s516_s9 = smov [#allocation10]  }
  0x25   :  { %s54_s10 = sshll.u32 %s516_s9, 4  ;;  %s55_s10 = int_to_ptr.vmem [resolvable:$true] %s54_s10 }
  0x26   :  { %s449_s11 = scalar_lea.vmem %s55_s10, 128  ;;  %p454_p2 = scmp.lt.s32.totalorder %s55_s10, %s55_s10 }
  0x27   :  { %p450_p1 = scmp.ne.s32.totalorder %s55_s10, %s449_s11  ;;  %p455_p3 = scmp.lt.s32.totalorder %s449_s11, %s449_s11 }
  0x29   :  { %p456_p4 = por %p455_p3, %p454_p2 }
  0x2b   :  { %p457_p5 = pnand %p456_p4, %p450_p1 }
  0x2d   :  { %460 = shalt.err (!%p457_p5)
}
  0x2e   :  { %57 = dma.hbm_to_vmem [thread:$0]  %s571_s3, 128, %s55_s10, [#allocation11]  }
  0x2f   :  { %501 = dma.done.wait [#allocation5], 512  }
  0x30   :  { %502 = vsyncadd [#allocation5], 4294966784 }
  0x31   :  { %503 = dma.done.wait [#allocation8], 8320  }
  0x32   :  { %504 = vsyncadd [#allocation8], 4294958976 }
  0x33   :  { %505 = dma.done.wait [#allocation11], 128  }
  0x34   :  { %506 = vsyncadd [#allocation11], 4294967168  ;;  %v517_v0 = vmov 0.0   ;;  %v144_v1 = vld [vmem:[#allocation7 + $0x1e8] sm:$0xff]  ;;  %v143_v2 = vld [vmem:[#allocation7 + $0x1e0] sm:$0xff]  ;;  %s518_s2 = smov [#allocation13]  }
  0x35   :  { %211 = vmatprep.mubr.f32.mxu0 %v517_v0  ;;  %282 = vmatprep.mubr.f32.mxu1 %v517_v0  ;;  %v140_v3 = vld [vmem:[#allocation7 + $0x1c8] sm:$0xff]  ;;  %v139_v4 = vld [vmem:[#allocation7 + $0x1c0] sm:$0xff]  ;;  %v146_v9 = vld [vmem:[#allocation7 + $0x1f8] sm:$0xff]  ;;  %s338_s3 = sshll.u32 %s518_s2, 4  ;;  %s339_s3 = int_to_ptr.vmem [resolvable:$true] %s338_s3 }
  0x36   :  { %147 = vmatprep.subr.mxu0 %v144_v1  ;;  %v136_v5 = vld [vmem:[#allocation7 + $0x1a8] sm:$0xff]  ;;  %v135_v6 = vld [vmem:[#allocation7 + $0x1a0] sm:$0xff]  ;;  %218 = vmatprep.subr.mxu1 %v146_v9  ;;  %v145_v11 = vld [vmem:[#allocation7 + $0x1f0] sm:$0xff]  ;;  %s461_s13 = scalar_lea.vmem %s339_s3, 128  ;;  %p466_p7 = scmp.lt.s32.totalorder %s339_s3, %s339_s3 }
  0x37   :  { %148 = vmatpush1.msra.mxu0 %v143_v2  ;;  %v132_v7 = vld [vmem:[#allocation7 + $0x188] sm:$0xff]  ;;  %v131_v8 = vld [vmem:[#allocation7 + $0x180] sm:$0xff]  ;;  %219 = vmatpush1.msra.mxu1 %v145_v11  ;;  %v142_v13 = vld [vmem:[#allocation7 + $0x1d8] sm:$0xff]  ;;  %p462_p6 = scmp.ne.s32.totalorder %s339_s3, %s461_s13  ;;  %p467_p8 = scmp.lt.s32.totalorder %s461_s13, %s461_s13 }
  0x38   :  { %149 = vmatprep.subr.mxu0 %v140_v3  ;;  %v128_v10 = vld [vmem:[#allocation7 + $0x168] sm:$0xff]  ;;  %v127_v12 = vld [vmem:[#allocation7 + $0x160] sm:$0xff]  ;;  %v141_v14 = vld [vmem:[#allocation7 + $0x1d0] sm:$0xff]  ;;  %220 = vmatprep.subr.mxu1 %v142_v13 }
  0x39   :  { %150 = vmatpush1.msra.mxu0 %v139_v4  ;;  %v124_v15 = vld [vmem:[#allocation7 + $0x148] sm:$0xff]  ;;  %v138_v16 = vld [vmem:[#allocation7 + $0x1b8] sm:$0xff]  ;;  %v123_v17 = vld [vmem:[#allocation7 + $0x140] sm:$0xff]  ;;  %221 = vmatpush1.msra.mxu1 %v141_v14  ;;  %p468_p9 = por %p467_p8, %p466_p7 }
  0x3a   :  { %151 = vmatprep.subr.mxu0 %v136_v5  ;;  %v137_v18 = vld [vmem:[#allocation7 + $0x1b0] sm:$0xff]  ;;  %v134_v19 = vld [vmem:[#allocation7 + $0x198] sm:$0xff]  ;;  %v120_v20 = vld [vmem:[#allocation7 + $0x128] sm:$0xff]  ;;  %222 = vmatprep.subr.mxu1 %v138_v16 }
  0x3b   :  { %152 = vmatpush1.msra.mxu0 %v135_v6  ;;  %v133_v21 = vld [vmem:[#allocation7 + $0x190] sm:$0xff]  ;;  %v119_v22 = vld [vmem:[#allocation7 + $0x120] sm:$0xff]  ;;  %223 = vmatpush1.msra.mxu1 %v137_v18  ;;  %v130_v23 = vld [vmem:[#allocation7 + $0x178] sm:$0xff]  ;;  %p469_p10 = pnand %p468_p9, %p462_p6 }
  0x3c   :  { %153 = vmatprep.subr.mxu0 %v132_v7  ;;  %v116_v24 = vld [vmem:[#allocation7 + $0x108] sm:$0xff]  ;;  %224 = vmatprep.subr.mxu1 %v134_v19  ;;  %v129_v25 = vld [vmem:[#allocation7 + $0x170] sm:$0xff]  ;;  %v115_v26 = vld [vmem:[#allocation7 + $0x100] sm:$0xff] }
  0x3d   :  { %154 = vmatpush1.msra.mxu0 %v131_v8  ;;  %225 = vmatpush1.msra.mxu1 %v133_v21  ;;  %v126_v27 = vld [vmem:[#allocation7 + $0x158] sm:$0xff]  ;;  %v112_v28 = vld [vmem:[#allocation7 + $0xe8] sm:$0xff]  ;;  %v125_v29 = vld [vmem:[#allocation7 + $0x150] sm:$0xff] }
  0x3e   :  { %155 = vmatprep.subr.mxu0 %v128_v10  ;;  %226 = vmatprep.subr.mxu1 %v130_v23  ;;  %v111_v30 = vld [vmem:[#allocation7 + $0xe0] sm:$0xff]  ;;  %v122_v31 = vld [vmem:[#allocation7 + $0x138] sm:$0xff]  ;;  %v108_v32 = vld [vmem:[#allocation7 + $0xc8] sm:$0xff] }
  0x3f   :  { %156 = vmatpush1.msra.mxu0 %v127_v12  ;;  %227 = vmatpush1.msra.mxu1 %v129_v25  ;;  %v121_v33 = vld [vmem:[#allocation7 + $0x130] sm:$0xff]  ;;  %v107_v34 = vld [vmem:[#allocation7 + $0xc0] sm:$0xff]  ;;  %v118_v35 = vld [vmem:[#allocation7 + $0x118] sm:$0xff] }
  0x40   :  { %157 = vmatprep.subr.mxu0 %v124_v15  ;;  %228 = vmatprep.subr.mxu1 %v126_v27  ;;  %v104_v36 = vld [vmem:[#allocation7 + $0xa8] sm:$0xff]  ;;  %v117_v37 = vld [vmem:[#allocation7 + $0x110] sm:$0xff]  ;;  %v103_v38 = vld [vmem:[#allocation7 + $0xa0] sm:$0xff] }
  0x41   :  { %158 = vmatpush1.msra.mxu0 %v123_v17  ;;  %229 = vmatpush1.msra.mxu1 %v125_v29  ;;  %v114_v39 = vld [vmem:[#allocation7 + $0xf8] sm:$0xff]  ;;  %v100_v40 = vld [vmem:[#allocation7 + $0x88] sm:$0xff]  ;;  %v113_v41 = vld [vmem:[#allocation7 + $0xf0] sm:$0xff] }
  0x42   :  { %159 = vmatprep.subr.mxu0 %v120_v20  ;;  %230 = vmatprep.subr.mxu1 %v122_v31  ;;  %v99_v42 = vld [vmem:[#allocation7 + $0x80] sm:$0xff]  ;;  %v110_v43 = vld [vmem:[#allocation7 + $0xd8] sm:$0xff]  ;;  %v96_v44 = vld [vmem:[#allocation7 + $0x68] sm:$0xff] }
  0x43   :  { %160 = vmatpush1.msra.mxu0 %v119_v22  ;;  %231 = vmatpush1.msra.mxu1 %v121_v33  ;;  %v109_v45 = vld [vmem:[#allocation7 + $0xd0] sm:$0xff]  ;;  %v95_v46 = vld [vmem:[#allocation7 + $0x60] sm:$0xff]  ;;  %v106_v47 = vld [vmem:[#allocation7 + $0xb8] sm:$0xff] }
  0x44   :  { %161 = vmatprep.subr.mxu0 %v116_v24  ;;  %232 = vmatprep.subr.mxu1 %v118_v35  ;;  %v92_v48 = vld [vmem:[#allocation7 + $0x48] sm:$0xff]  ;;  %v105_v49 = vld [vmem:[#allocation7 + $0xb0] sm:$0xff]  ;;  %v91_v50 = vld [vmem:[#allocation7 + $0x40] sm:$0xff] }
  0x45   :  { %162 = vmatpush1.msra.mxu0 %v115_v26  ;;  %233 = vmatpush1.msra.mxu1 %v117_v37  ;;  %v102_v51 = vld [vmem:[#allocation7 + $0x98] sm:$0xff]  ;;  %v88_v52 = vld [vmem:[#allocation7 + $0x28] sm:$0xff]  ;;  %v101_v53 = vld [vmem:[#allocation7 + $0x90] sm:$0xff] }
  0x46   :  { %163 = vmatprep.subr.mxu0 %v112_v28  ;;  %234 = vmatprep.subr.mxu1 %v114_v39  ;;  %v87_v54 = vld [vmem:[#allocation7 + $0x20] sm:$0xff]  ;;  %v98_v55 = vld [vmem:[#allocation7 + $0x78] sm:$0xff]  ;;  %v84_v56 = vld [vmem:[#allocation7 + $0x8] sm:$0xff] }
  0x47   :  { %164 = vmatpush1.msra.mxu0 %v111_v30  ;;  %235 = vmatpush1.msra.mxu1 %v113_v41  ;;  %v97_v57 = vld [vmem:[#allocation7 + $0x70] sm:$0xff]  ;;  %v83_v58 = vld [vmem:[#allocation7] sm:$0xff]  ;;  %v94_v59 = vld [vmem:[#allocation7 + $0x58] sm:$0xff] }
  0x48   :  { %165 = vmatprep.subr.mxu0 %v108_v32  ;;  %236 = vmatprep.subr.mxu1 %v110_v43  ;;  %v74_v60 = vld [vmem:[#allocation9] sm:$0xff]  ;;  %v93_v61 = vld [vmem:[#allocation7 + $0x50] sm:$0xff]  ;;  %v90_v62 = vld [vmem:[#allocation7 + $0x38] sm:$0xff] }
  0x49   :  { %166 = vmatpush1.msra.mxu0 %v107_v34  ;;  %237 = vmatpush1.msra.mxu1 %v109_v45  ;;  %v89_v63 = vld [vmem:[#allocation7 + $0x30] sm:$0xff]  ;;  %v86_v0 = vld [vmem:[#allocation7 + $0x18] sm:$0xff]  ;;  %v78_v2 = vld [vmem:[#allocation4] sm:$0xff] }
  0x4a   :  { %167 = vmatprep.subr.mxu0 %v104_v36  ;;  %238 = vmatprep.subr.mxu1 %v106_v47  ;;  %v85_v1 = vld [vmem:[#allocation7 + $0x10] sm:$0xff]  ;;  %v79_v4 = vld [vmem:[#allocation4 + $0x8] sm:$0xff]  ;;  %v81_v13 = vld [vmem:[#allocation4 + $0x18] sm:$0xff] }
  0x4b   :  { %168 = vmatpush1.msra.mxu0 %v103_v38  ;;  %239 = vmatpush1.msra.mxu1 %v105_v49  ;;  %v80_v10 = vld [vmem:[#allocation4 + $0x10] sm:$0xff]  ;;  %v76_v24 = vld [vmem:[#allocation10] sm:$0xff] }
  0x4c   :  { %169 = vmatprep.subr.mxu0 %v100_v40  ;;  %240 = vmatprep.subr.mxu1 %v102_v51 }
  0x4d   :  { %170 = vmatpush1.msra.mxu0 %v99_v42  ;;  %241 = vmatpush1.msra.mxu1 %v101_v53 }
  0x4e   :  { %171 = vmatprep.subr.mxu0 %v96_v44  ;;  %242 = vmatprep.subr.mxu1 %v98_v55 }
  0x4f   :  { %172 = vmatpush1.msra.mxu0 %v95_v46  ;;  %243 = vmatpush1.msra.mxu1 %v97_v57 }
  0x50   :  { %173 = vmatprep.subr.mxu0 %v92_v48  ;;  %244 = vmatprep.subr.mxu1 %v94_v59 }
  0x51   :  { %174 = vmatpush1.msra.mxu0 %v91_v50  ;;  %245 = vmatpush1.msra.mxu1 %v93_v61 }
  0x52   :  { %175 = vmatprep.subr.mxu0 %v88_v52  ;;  %246 = vmatprep.subr.mxu1 %v90_v62 }
  0x53   :  { %176 = vmatpush1.msra.mxu0 %v87_v54  ;;  %247 = vmatpush1.msra.mxu1 %v89_v63 }
  0x54   :  { %177 = vmatprep.subr.mxu0 %v84_v56  ;;  %248 = vmatprep.subr.mxu1 %v86_v0 }
  0x55   :  { %178 = vmatpush1.msra.mxu0 %v83_v58  ;;  %249 = vmatpush1.msra.mxu1 %v85_v1 }
  0x56   :  { %212 = vmatmul.mubr.f32.vlgmr.msra.gmra.mxu0 %v74_v60  ;;  %283 = vmatmul.mubr.f32.vlgmr.msra.gmra.mxu1 %v74_v60 }
 0x116   :  { %v213_v3 = vpop.f32.mrf.mxu0  ;;  %v284_v11 = vpop.f32.mrf.mxu1 }
 0x117   :  { %v289_v5 = vadd.f32 %v213_v3, %v78_v2  ;;  %v291_v12 = vadd.f32 %v284_v11, %v80_v10 }
 0x118   :  { %v215_v6 = vpop.f32.mrf.mxu0  ;;  %v286_v14 = vpop.f32.mrf.mxu1 }
 0x119   :  { %v353_v7 = vmul.f32 -1.442695, %v289_v5  ;;  %v290_v8 = vadd.f32 %v215_v6, %v79_v4  ;;  %v355_v15 = vmul.f32 -1.442695, %v291_v12  ;;  %v292_v16 = vadd.f32 %v286_v14, %v81_v13 }
 0x11b   :  { %365 = vpow2.f32 %v353_v7  ;;  %v354_v9 = vmul.f32 -1.442695, %v290_v8 }
 0x11d   :  { %367 = vpow2.f32 %v354_v9 }
 0x11e   :  { %369 = vpow2.f32 %v355_v15 }
 0x11f   :  { %371 = vtanh.f32 %v292_v16 }
 0x128   :  { %v366_v17 = vpop.eup %365 }
 0x129   :  { %v296_v18 = vadd.f32 1.0, %v366_v17 }
 0x12a   :  { %v368_v19 = vpop.eup %367 }
 0x12b   :  { %373 = vrcp.f32 %v296_v18  ;;  %v302_v20 = vadd.f32 1.0, %v368_v19  ;;  %v370_v21 = vpop.eup %369 }
 0x12c   :  { %v372_v22 = vpop.eup %371  ;;  %v308_v26 = vadd.f32 1.0, %v370_v21 }
 0x12d   :  { %375 = vrcp.f32 %v302_v20 }
 0x12e   :  { %377 = vrcp.f32 %v308_v26 }
 0x138   :  { %v374_v23 = vpop.eup %373 }
 0x139   :  { %v314_v28 = vmul.f32 %v374_v23, %v372_v22 }
 0x13a   :  { %v376_v25 = vpop.eup %375 }
 0x13b   :  { %v313_v27 = vmul.f32 %v376_v25, %v76_v24 }
 0x13d   :  { %v315_v29 = vadd.f32 %v314_v28, %v313_v27 }
 0x13f   :  { %321 = vst [vmem:[#allocation13] sm:$0xff] %v315_v29  ;;  %379 = vtanh.f32 %v315_v29 }
 0x140   :  { %472 = shalt.err (!%p469_p10)
}
 0x141   :  { %341 = dma.vmem_to_hbm [thread:$0]  %s339_s3, 128, %s573_s5, [#allocation14]   ;;  %v378_v30 = vpop.eup %377 }
 0x142   :  { %s519_s16 = smov [#allocation12]  }
 0x143   :  { %s328_s17 = sshll.u32 %s519_s16, 4  ;;  %s329_s17 = int_to_ptr.vmem [resolvable:$true] %s328_s17 }
 0x144   :  { %s481_s18 = scalar_lea.vmem %s329_s17, 128  ;;  %p486_p12 = scmp.lt.s32.totalorder %s329_s17, %s329_s17 }
 0x145   :  { %p482_p11 = scmp.ne.s32.totalorder %s329_s17, %s481_s18  ;;  %p487_p13 = scmp.lt.s32.totalorder %s481_s18, %s481_s18 }
 0x147   :  { %p488_p0 = por %p487_p13, %p486_p12 }
 0x149   :  { %p489_p1 = pnand %p488_p0, %p482_p11 }
 0x14c   :  { %v380_v31 = vpop.eup %379 }
 0x14d   :  { %v317_v32 = vmul.f32 %v380_v31, %v378_v30 }
 0x14f   :  { %320 = vst [vmem:[#allocation12] sm:$0xff] %v317_v32 }
 0x150   :  { %492 = shalt.err (!%p489_p1)
}
 0x151   :  { %331 = dma.vmem_to_hbm [thread:$0]  %s329_s17, 128, %s572_s4, [#allocation6]  }
 0x152   :  { %507 = dma.done.wait [#allocation6], 128  }
 0x153   :  { %508 = vsyncadd [#allocation6], 4294967168 }
 0x154   :  { %509 = dma.done.wait [#allocation14], 128  }
 0x155   :  { %510 = vsyncadd [#allocation14], 4294967168 }
 0x156   :  { %348 = vsyncpa [#allocation5], 1 }
 0x157   :  { %349 = vsyncpa [#allocation8], 1 }
 0x158   :  { %350 = vsyncpa [#allocation11], 1 }
 0x159   :  { %351 = vsyncpa [#allocation6], 1 }
 0x15a   :  { %352 = vsyncpa [#allocation14], 1 }

</bundles_post_ra>
